<compile_context>
chip_gen: v7x
topology: tpu7x:2x2x1
jax: 0.10.0
libtpu: 0.0.40
codegen_flags: <defaults>
</compile_context>

<pallas_src>
import functools

import jax
import jax.numpy as jnp
from jax.experimental import pallas as pl
from jax.experimental.pallas import tpu as pltpu


# ---------------------------------------------------------------------------
# Configuration constants.
# ---------------------------------------------------------------------------
_W_BUFS = 1        # resident weights/biases: single buffer (constant index_map)
_STREAM_BUFS = 3   # x / out streams: 3-deep pipeline (compute per tile is tiny)
_MIN_GRID_STEPS = 4  # keep >= this many batch steps when B allows (v7x megacore)
_MAX_TILE_B = 2048   # beyond ~2K rows per step the 0.35us step overhead is noise


def _round_up(x, m):
    return (x + m - 1) // m * m


def _query_vmem_capacity():
    try:
        return int(pltpu.get_tpu_info().vmem_capacity_bytes)
    except Exception:
        return 64 << 20  # conservative (v7x per-TC) floor if the query fails


_VMEM_CAP = _query_vmem_capacity()


# ---------------------------------------------------------------------------
# Kernel.
# ---------------------------------------------------------------------------
def project_head_kernel(x_ref, w1_ref, b1_ref, w2_ref, b2_ref, o_ref, *,
                        total_rows, tile_rows, mask_rows):
    # Cast the streamed x tile to bf16 in-kernel (VPU work, hidden under the
    # mem-bound pipeline) so both matmuls run at full bf16 MXU rate.
    x = x_ref[...].astype(jnp.bfloat16)                              # [TB, in]

    # Hidden layer: Linear(in_dim -> in_dim) + ReLU, f32 accumulation.
    h = jnp.dot(x, w1_ref[...], preferred_element_type=jnp.float32)  # f32
    h = jnp.maximum(h + b1_ref[...], 0.0)

    # Projection layer: Linear(in_dim -> feat_pad), bf16 weights, f32 accum.
    z = jnp.dot(h.astype(jnp.bfloat16), w2_ref[...],
                preferred_element_type=jnp.float32) + b2_ref[...]    # [TB, feat]

    if mask_rows:
        # Last (partial) batch tile: zero the padded rows so garbage data can't
        # produce inf/NaN through z*z -> rsqrt.  (Those rows are never stored
        # back anyway; this just keeps the math clean.)
        row = jax.lax.broadcasted_iota(jnp.int32, z.shape, 0)
        valid = (pl.program_id(0) * tile_rows + row) < total_rows
        z = jnp.where(valid, z, 0.0)

    # F.normalize(p=2, dim=1): z / max(||z||, 1e-12) == z * rsqrt(max(||z||^2, 1e-24))
    sq = jnp.sum(z * z, axis=-1, keepdims=True)
    inv = jax.lax.rsqrt(jnp.maximum(sq, 1e-24))                      # EUP, not VALU
    o_ref[...] = (z * inv).astype(o_ref.dtype)


# ---------------------------------------------------------------------------
# Parameter preparation (call ONCE at init time, not per forward pass).
# ---------------------------------------------------------------------------
def prepare_project_head_params(w1, b1, w2, b2):
    """One-time parameter prep: cast the big weights to bf16, keep biases f32,
    and pad the projection width to a lane-dense multiple of 128 so output
    stores stay unmasked.  Store the results -- casting per call under jit
    would re-read the f32 weights from HBM every invocation."""
    feat_dim = int(w2.shape[1])
    feat_pad = _round_up(feat_dim, 128)
    w2p = w2
    b2p = jnp.reshape(b2, (1, -1))
    if feat_pad != feat_dim:
        w2p = jnp.pad(w2p, ((0, 0), (0, feat_pad - feat_dim)))
        b2p = jnp.pad(b2p, ((0, 0), (0, feat_pad - feat_dim)))
    return (w1.astype(jnp.bfloat16),
            jnp.reshape(b1, (1, -1)).astype(jnp.float32),
            w2p.astype(jnp.bfloat16),
            b2p.astype(jnp.float32),
            feat_dim)


# ---------------------------------------------------------------------------
# Tiling / VMEM sizing.
# ---------------------------------------------------------------------------
def _choose_tile_b(B, in_dim, feat_pad, x_bytes, out_bytes, weight_vmem,
                   x_bufs, out_bufs):
    per_row = (x_bufs * in_dim * x_bytes            # streamed x tiles
               + out_bufs * feat_pad * out_bytes    # streamed out tiles
               + in_dim * (2 + 4 + 2)               # x bf16 + h f32 + h bf16
               + feat_pad * 4)                      # z f32
    budget = _VMEM_CAP - weight_vmem - (8 << 20)    # compiler/pipeline headroom
    tb = max(16, min(_MAX_TILE_B, budget // per_row))
    # Keep the batch grid with >= _MIN_GRID_STEPS steps when B is large enough,
    # so the "parallel" axis can actually spread across both v7x TensorCores.
    if B >= 2 * 16:
        tb = min(tb, max(16, _round_up(pl.cdiv(B, _MIN_GRID_STEPS), 16)))
    if tb >= B:
        return B                      # single full-batch tile (always layout-legal)
    return max(16, (tb // 16) * 16)   # multiple of 16 for bf16 sublane packing


# ---------------------------------------------------------------------------
# Forward pass.
# ---------------------------------------------------------------------------
@functools.partial(jax.jit, static_argnames=(
    "feat_dim", "out_dtype", "tile_b", "weight_bufs", "stream_bufs"))
def _forward(x, w1, b1, w2, b2, *, feat_dim, out_dtype, tile_b,
             weight_bufs, stream_bufs):
    B, in_dim = x.shape
    feat_pad = w2.shape[1]

    x_bytes = x.dtype.itemsize
    out_bytes = jnp.dtype(out_dtype).itemsize
    eff_w = weight_bufs if weight_bufs else 2     # 0 => compiler default (2)
    eff_s = stream_bufs if stream_bufs else 2

    weight_vmem = eff_w * ((in_dim * in_dim + in_dim * feat_pad) * w1.dtype.itemsize
                           + (in_dim + feat_pad) * 4)

    tb = tile_b if tile_b is not None else _choose_tile_b(
        B, in_dim, feat_pad, x_bytes, out_bytes, weight_vmem, eff_s, eff_s)
    tb = min(tb, B)
    grid = (pl.cdiv(B, tb),)
    mask_rows = (B % tb) != 0

    # Scoped-VMEM limit from the actual footprint (floor 32 MiB > defaults,
    # ceiling just under physical capacity -- 64 MiB on v7x, 128 on v5e/v6e).
    stream_vmem = tb * (eff_s * in_dim * x_bytes + eff_s * feat_pad * out_bytes)
    interm_vmem = tb * (in_dim * 8 + feat_pad * 4)
    footprint = weight_vmem + stream_vmem + interm_vmem
    vmem_limit = int(min(max(footprint + (8 << 20), 32 << 20),
                         _VMEM_CAP - (2 << 20)))

    cost = pl.CostEstimate(
        flops=2 * B * in_dim * (in_dim + feat_pad),
        transcendentals=B,  # one rsqrt per row
        bytes_accessed=(B * in_dim * x_bytes
                        + (in_dim * in_dim + in_dim * feat_pad) * w1.dtype.itemsize
                        + (in_dim + feat_pad) * 4
                        + B * feat_pad * out_bytes),
    )

    def spec(shape, imap, bufs):
        if bufs:
            return pl.BlockSpec(shape, imap, pipeline_mode=pl.Buffered(bufs))
        return pl.BlockSpec(shape, imap)

    kernel = functools.partial(project_head_kernel,
                               total_rows=B, tile_rows=tb, mask_rows=mask_rows)

    out = pl.pallas_call(
        kernel,
        out_shape=jax.ShapeDtypeStruct((B, feat_pad), out_dtype),
        grid=grid,
        in_specs=[
            # x: streamed in batch tiles, pipelined against compute.
            spec((tb, in_dim), lambda i: (i, 0), stream_bufs),
            # Weights/biases: constant index_map -> DMA'd once, resident in
            # VMEM, single-buffered (no point double-buffering a fixed block).
            spec((in_dim, in_dim), lambda i: (0, 0), weight_bufs),
            spec((1, in_dim), lambda i: (0, 0), weight_bufs),
            spec((in_dim, feat_pad), lambda i: (0, 0), weight_bufs),
            spec((1, feat_pad), lambda i: (0, 0), weight_bufs),
        ],
        out_specs=spec((tb, feat_pad), lambda i: (i, 0), stream_bufs),
        compiler_params=pltpu.CompilerParams(
            dimension_semantics=("parallel",),  # batch tiles independent (megacore)
            vmem_limit_bytes=vmem_limit,
        ),
        cost_estimate=cost,
    )(x, w1, b1, w2, b2)

    if feat_dim is not None and feat_dim != feat_pad:
        out = out[:, :feat_dim]
    return out


def project_head(x, w1, b1, w2, b2, *, feat_dim=None,
                 out_dtype=jnp.bfloat16, tile_b=None):
    """Fused ProjectHead('mlp') forward.

    Expects parameters from prepare_project_head_params (bf16 weights, f32
    biases, feat padded to a multiple of 128).  x is streamed in its stored
    dtype and cast to bf16 inside the kernel; output defaults to bf16 to halve
    the dominant HBM writeback stream (pass out_dtype=jnp.float32 otherwise).
    """
    try:
        return _forward(x, w1, b1, w2, b2, feat_dim=feat_dim, out_dtype=out_dtype,
                        tile_b=tile_b, weight_bufs=_W_BUFS, stream_bufs=_STREAM_BUFS)
    except Exception:
        # Defensive fallback: if this jax build rejects pipeline_mode /
        # pl.Buffered buffer counts, rerun with the compiler's default
        # double-buffering (perf-only difference, identical numerics).
        return _forward(x, w1, b1, w2, b2, feat_dim=feat_dim, out_dtype=out_dtype,
                        tile_b=tile_b, weight_bufs=0, stream_bufs=0)


# ---------------------------------------------------------------------------
# Pure-JAX reference (f32) for correctness checking.
# ---------------------------------------------------------------------------
def reference_f32(x, w1, b1, w2, b2):
    h = jnp.maximum(x @ w1 + b1, 0.0)
    z = h @ w2 + b2
    n = jnp.sqrt(jnp.sum(z * z, axis=-1, keepdims=True))
    return z / jnp.maximum(n, 1e-12)


if __name__ == "__main__":
    B, in_dim, feat_dim = 8, 32, 128

    key = jax.random.PRNGKey(0)
    kx, k1, kb1, k2, kb2 = jax.random.split(key, 5)

    x = jax.random.normal(kx, (B, in_dim), dtype=jnp.float32)

    # Deterministic synthetic parameter init (uniform ~ 1/sqrt(fan_in), like
    # torch nn.Linear); weights stored pre-transposed as [in, out].
    s1 = 1.0 / jnp.sqrt(jnp.float32(in_dim))
    w1 = jax.random.uniform(k1, (in_dim, in_dim), jnp.float32, -s1, s1)
    b1 = jax.random.uniform(kb1, (1, in_dim), jnp.float32, -s1, s1)
    w2 = jax.random.uniform(k2, (in_dim, feat_dim), jnp.float32, -s1, s1)
    b2 = jax.random.uniform(kb2, (1, feat_dim), jnp.float32, -s1, s1)

    # One-time parameter prep (bf16 weights, padded feat) -- init time, not per call.
    w1b, b1f, w2b, b2f, fdim = prepare_project_head_params(w1, b1, w2, b2)

    out = project_head(x, w1b, b1f, w2b, b2f, feat_dim=fdim)
    out = jax.block_until_ready(out)

    ref = reference_f32(x, w1, b1, w2, b2)
    assert out.shape == (B, feat_dim)

    outf = out.astype(jnp.float32)
    # bf16 weights / in-kernel bf16 x cast / bf16 output -> loose tolerance vs f32 ref.
    assert jnp.allclose(outf, ref, atol=3e-2, rtol=3e-2), (
        float(jnp.max(jnp.abs(outf - ref))))
    # Output rows must be (approximately) unit-norm regardless of precision.
    norms = jnp.sqrt(jnp.sum(outf * outf, axis=-1))
    assert jnp.allclose(norms, 1.0, atol=1e-2), norms

    print("KERNEL_OK")
</pallas_src>

<mosaic_0001>
module attributes {stable_mosaic.version = 11 : i64} {
  func.func @project_head_kernel(%arg0: i32, %arg1: memref<8x32xf32, #tpu.memory_space<vmem>>, %arg2: memref<32x32xbf16, #tpu.memory_space<vmem>>, %arg3: memref<1x32xf32, #tpu.memory_space<vmem>>, %arg4: memref<32x128xbf16, #tpu.memory_space<vmem>>, %arg5: memref<1x128xf32, #tpu.memory_space<vmem>>, %arg6: memref<8x128xbf16, #tpu.memory_space<vmem>>) attributes {dimension_semantics = [#tpu.dimension_semantics<parallel>], iteration_bounds = array<i64: 1>, scalar_prefetch = 0 : i64, scratch_operands = 0 : i64, tpu.core_type = #tpu.core_type<tc>, window_params = [{transform_indices = @transform_0, window_bounds = array<i64: 8, 32>}, {pipeline_mode = #tpu.pipeline_mode<synchronous>, transform_indices = @transform_1, window_bounds = array<i64: 32, 32>}, {pipeline_mode = #tpu.pipeline_mode<synchronous>, transform_indices = @transform_2, window_bounds = array<i64: 1, 32>}, {pipeline_mode = #tpu.pipeline_mode<synchronous>, transform_indices = @transform_3, window_bounds = array<i64: 32, 128>}, {pipeline_mode = #tpu.pipeline_mode<synchronous>, transform_indices = @transform_4, window_bounds = array<i64: 1, 128>}, {transform_indices = @transform_5, window_bounds = array<i64: 8, 128>}]} {
    %c0 = arith.constant 0 : index
    %c0_0 = arith.constant 0 : index
    %0 = vector.load %arg1[%c0, %c0_0] : memref<8x32xf32, #tpu.memory_space<vmem>>, vector<8x32xf32>
    %1 = arith.truncf %0 : vector<8x32xf32> to vector<8x32xbf16>
    %c0_1 = arith.constant 0 : index
    %c0_2 = arith.constant 0 : index
    %2 = vector.load %arg2[%c0_1, %c0_2] : memref<32x32xbf16, #tpu.memory_space<vmem>>, vector<32x32xbf16>
    %cst = arith.constant dense<0.000000e+00> : vector<8x32xf32>
    %3 = tpu.matmul %1, %2, %cst {dimension_numbers = #tpu.dot_dimension_numbers<[1], [0], [0], [1], [0, 0, 1, 1], [], []>} : vector<8x32xbf16>, vector<32x32xbf16>, vector<8x32xf32> -> vector<8x32xf32>
    %c0_3 = arith.constant 0 : index
    %c0_4 = arith.constant 0 : index
    %4 = vector.load %arg3[%c0_3, %c0_4] : memref<1x32xf32, #tpu.memory_space<vmem>>, vector<1x32xf32>
    %5 = vector.broadcast %4 : vector<1x32xf32> to vector<8x32xf32>
    %6 = arith.addf %3, %5 : vector<8x32xf32>
    %cst_5 = arith.constant 0.000000e+00 : f32
    %7 = vector.broadcast %cst_5 : f32 to vector<8x32xf32>
    %8 = arith.maximumf %6, %7 : vector<8x32xf32>
    %9 = arith.truncf %8 : vector<8x32xf32> to vector<8x32xbf16>
    %c0_6 = arith.constant 0 : index
    %c0_7 = arith.constant 0 : index
    %10 = vector.load %arg4[%c0_6, %c0_7] : memref<32x128xbf16, #tpu.memory_space<vmem>>, vector<32x128xbf16>
    %cst_8 = arith.constant dense<0.000000e+00> : vector<8x128xf32>
    %11 = tpu.matmul %9, %10, %cst_8 {dimension_numbers = #tpu.dot_dimension_numbers<[1], [0], [0], [1], [0, 0, 1, 1], [], []>} : vector<8x32xbf16>, vector<32x128xbf16>, vector<8x128xf32> -> vector<8x128xf32>
    %c0_9 = arith.constant 0 : index
    %c0_10 = arith.constant 0 : index
    %12 = vector.load %arg5[%c0_9, %c0_10] : memref<1x128xf32, #tpu.memory_space<vmem>>, vector<1x128xf32>
    %13 = vector.broadcast %12 : vector<1x128xf32> to vector<8x128xf32>
    %14 = arith.addf %11, %13 : vector<8x128xf32>
    %15 = arith.mulf %14, %14 : vector<8x128xf32>
    %cst_11 = arith.constant dense<0.000000e+00> : vector<8xf32>
    %16 = vector.multi_reduction <add>, %15, %cst_11 [1] : vector<8x128xf32> to vector<8xf32>
    %17 = vector.shape_cast %16 : vector<8xf32> to vector<8x1xf32>
    %cst_12 = arith.constant 1.000000e-24 : f32
    %18 = vector.broadcast %cst_12 : f32 to vector<8x1xf32>
    %19 = arith.maximumf %17, %18 : vector<8x1xf32>
    %20 = math.rsqrt %19 : vector<8x1xf32>
    %21 = vector.broadcast %20 : vector<8x1xf32> to vector<8x128xf32>
    %22 = arith.mulf %14, %21 : vector<8x128xf32>
    %23 = arith.truncf %22 : vector<8x128xf32> to vector<8x128xbf16>
    %c0_13 = arith.constant 0 : index
    %c0_14 = arith.constant 0 : index
    %24 = vector.load %arg6[%c0_13, %c0_14] : memref<8x128xbf16, #tpu.memory_space<vmem>>, vector<8x128xbf16>
    tpu.vector_store %arg6[%c0_13, %c0_14], %23 {strides = array<i32>} : memref<8x128xbf16, #tpu.memory_space<vmem>>, vector<8x128xbf16>,
    return
  }
  func.func @transform_0(%arg0: i32) -> (i32, i32) {
    %c0_i32 = arith.constant 0 : i32
    %c0_i32_0 = arith.constant 0 : i32
    return %arg0, %c0_i32 : i32, i32
  }
  func.func @transform_1(%arg0: i32) -> (i32, i32) {
    %c0_i32 = arith.constant 0 : i32
    %c0_i32_0 = arith.constant 0 : i32
    %c0_i32_1 = arith.constant 0 : i32
    return %c0_i32, %c0_i32_0 : i32, i32
  }
  func.func @transform_2(%arg0: i32) -> (i32, i32) {
    %c0_i32 = arith.constant 0 : i32
    %c0_i32_0 = arith.constant 0 : i32
    %c0_i32_1 = arith.constant 0 : i32
    return %c0_i32, %c0_i32_0 : i32, i32
  }
  func.func @transform_3(%arg0: i32) -> (i32, i32) {
    %c0_i32 = arith.constant 0 : i32
    %c0_i32_0 = arith.constant 0 : i32
    %c0_i32_1 = arith.constant 0 : i32
    return %c0_i32, %c0_i32_0 : i32, i32
  }
  func.func @transform_4(%arg0: i32) -> (i32, i32) {
    %c0_i32 = arith.constant 0 : i32
    %c0_i32_0 = arith.constant 0 : i32
    %c0_i32_1 = arith.constant 0 : i32
    return %c0_i32, %c0_i32_0 : i32, i32
  }
  func.func @transform_5(%arg0: i32) -> (i32, i32) {
    %c0_i32 = arith.constant 0 : i32
    %c0_i32_0 = arith.constant 0 : i32
    return %arg0, %c0_i32 : i32, i32
  }
}

</mosaic_0001>

<bundles_post_ra>
// kernel: _forward.1
= control target key start
LH: loop header
LB: loop body
LE: loop exit
PB: predicated region body
PF: predicated region fallthrough
CT: control target
= control target key end

     0   :  { %10 = vsyncpa [#allocation3], 0  ;;  %s458_s0 = inlined_call_operand.hbm [shape: f32[8,32], index: 0, kind: input, shape index: {}]   ;;  %s459_s1 = inlined_call_operand.hbm [shape: bf16[32,32], index: 1, kind: input, shape index: {}]   ;;  %s460_s2 = inlined_call_operand.vmem [shape: f32[1,32], index: 2, kind: input, shape index: {}]   ;;  %s461_s3 = inlined_call_operand.hbm [shape: bf16[32,128], index: 3, kind: input, shape index: {}]   ;;  %s462_s4 = inlined_call_operand.vmem [shape: f32[1,128], index: 4, kind: input, shape index: {}]   ;;  %s463_s5 = inlined_call_operand.hbm [shape: bf16[8,128], index: 5, kind: output, shape index: {}]  }
   0x1   :  { %11 = vsyncpa [#allocation6], 0 }
   0x2   :  { %12 = vsyncpa [#allocation4], 0  ;;  %s360_s18 = smov [#allocation5]   ;;  %s266_s22 = scalar_lea.hbm %s459_s1, 256 }
   0x3   :  { %s28_s19 = sshll.u32 %s360_s18, 4  ;;  %p267_p0 = scmp.ne.s32.totalorder %s459_s1, %s266_s22  ;;  %s29_s19 = int_to_ptr.vmem [resolvable:$true] %s28_s19 }
   0x4   :  { %p270_p1 = scmp.lt.u32.totalorder %s266_s22, %s459_s1 }
   0x6   :  { %p272_p2 = pnand %p270_p1, %p267_p0 }
   0x8   :  { %275 = shalt.err (!%p272_p2)
}
   0x9   :  { %s276_s27 = scalar_lea.vmem %s29_s19, 256  ;;  %p281_p4 = scmp.lt.s32.totalorder %s29_s19, %s29_s19 }
   0xa   :  { %p277_p3 = scmp.ne.s32.totalorder %s29_s19, %s276_s27  ;;  %p282_p5 = scmp.lt.s32.totalorder %s276_s27, %s276_s27 }
   0xc   :  { %p283_p6 = por %p282_p5, %p281_p4 }
   0xe   :  { %p284_p7 = pnand %p283_p6, %p277_p3 }
  0x10   :  { %287 = shalt.err (!%p284_p7)
}
  0x11   :  { %s361_s28 = smov 64   ;;  %s362_s29 = smov 4  }
  0x12   :  { %34 = dma.hbm_to_vmem [thread:$0]  %s459_s1, 256, %s29_s19, [#allocation6], %s361_s28, %s361_s28, %s362_s29  }
  0x13   :  { %s363_s7 = smov [#allocation2]   ;;  %s364_s9 = smov [#allocation7]  }
  0x14   :  { %s19_s8 = sshll.u32 %s363_s7, 4  ;;  %s42_s10 = sshll.u32 %s364_s9, 4  ;;  %s20_s8 = int_to_ptr.vmem [resolvable:$true] %s19_s8  ;;  %s43_s10 = int_to_ptr.vmem [resolvable:$true] %s42_s10 }
  0x15   :  { %s288_s13 = scalar_lea.hbm %s458_s0, 128 }
  0x16   :  { %p289_p8 = scmp.ne.s32.totalorder %s458_s0, %s288_s13  ;;  %p292_p9 = scmp.lt.u32.totalorder %s288_s13, %s458_s0 }
  0x18   :  { %p294_p10 = pnand %p292_p9, %p289_p8 }
  0x1a   :  { %297 = shalt.err (!%p294_p10)
}
  0x1b   :  { %s298_s1 = scalar_lea.vmem %s20_s8, 128  ;;  %p303_p12 = scmp.lt.s32.totalorder %s20_s8, %s20_s8 }
  0x1c   :  { %p299_p11 = scmp.ne.s32.totalorder %s20_s8, %s298_s1  ;;  %p304_p13 = scmp.lt.s32.totalorder %s298_s1, %s298_s1 }
  0x1e   :  { %p305_p0 = por %p304_p13, %p303_p12 }
  0x20   :  { %p306_p1 = pnand %p305_p0, %p299_p11 }
  0x22   :  { %309 = shalt.err (!%p306_p1)
}
  0x23   :  { %22 = dma.hbm_to_vmem [thread:$0]  %s458_s0, 128, %s20_s8, [#allocation3]  }
  0x24   :  { %s310_s22 = scalar_lea.hbm %s461_s3, 256 }
  0x25   :  { %p311_p2 = scmp.ne.s32.totalorder %s461_s3, %s310_s22  ;;  %p314_p3 = scmp.lt.u32.totalorder %s310_s22, %s461_s3 }
  0x27   :  { %p316_p4 = pnand %p314_p3, %p311_p2 }
  0x29   :  { %319 = shalt.err (!%p316_p4)
}
  0x2a   :  { %s320_s27 = scalar_lea.vmem %s43_s10, 256  ;;  %p325_p6 = scmp.lt.s32.totalorder %s43_s10, %s43_s10 }
  0x2b   :  { %p321_p5 = scmp.ne.s32.totalorder %s43_s10, %s320_s27  ;;  %p326_p7 = scmp.lt.s32.totalorder %s320_s27, %s320_s27 }
  0x2d   :  { %p327_p8 = por %p326_p7, %p325_p6 }
  0x2f   :  { %p328_p9 = pnand %p327_p8, %p321_p5 }
  0x31   :  { %331 = shalt.err (!%p328_p9)
}
  0x32   :  { %48 = dma.hbm_to_vmem [thread:$0]  %s461_s3, 256, %s43_s10, [#allocation6], %s361_s28, %s361_s28, %s362_s29  }
  0x33   :  { %354 = dma.done.wait [#allocation3], 128  }
  0x34   :  { %355 = vsyncadd [#allocation3], 4294967168 }
  0x35   :  { %356 = dma.done.wait [#allocation6], 512  }
  0x36   :  { %357 = vsyncadd [#allocation6], 4294966784  ;;  %v365_v0 = vmov 0.0   ;;  %vm366_vm0 = vmmov 0   ;;  %v260_v1 = vld [vmem:[#allocation5] sm:$0xff]   ;;  %v261_v2 = vld [vmem:[#allocation5 + $0x8] sm:$0xff]  }
  0x37   :  { %236 = vmatprep.subr.bf16.mxu0 %v365_v0  ;;  %240 = vmatprep.mubr.msk.bf16.mxu0 %vm366_vm0, %v365_v0  ;;  %v61_v3 = vld [vmem:[#allocation2] sm:$0xff]  ;;  %vm86_vm1 = vcmask 261120   ;;  %v262_v5 = vld [vmem:[#allocation7] sm:$0xff]  }
  0x38   :  { %244 = vmatprep.subr.bf16.mxu1 %v365_v0  ;;  %248 = vmatprep.mubr.msk.bf16.mxu1 %vm366_vm0, %v365_v0  ;;  %v62_v4 = vpack.c.bf16 %v61_v3, %v61_v3  ;;  %v263_v6 = vld [vmem:[#allocation7 + $0x8] sm:$0xff]  }
  0x39   :  { %237 = vmatpush3.bf16.msra.mxu0 %v260_v1  ;;  %245 = vmatpush3.bf16.msra.mxu1 %v262_v5  ;;  %v222_v7 = vld [vmem:[%s460_s2] ss:$0 sm:$0xff]  ;;  %s367_s2 = smov [#allocation8]  }
  0x3a   :  { %238 = vmatprep.subr.bf16.mxu0 %v365_v0  ;;  %246 = vmatprep.subr.bf16.mxu1 %v365_v0  ;;  %v226_v15 = vld [vmem:[%s462_s4] ss:$0 sm:$0xff]  ;;  %s212_s7 = sshll.u32 %s367_s2, 4  ;;  %s213_s7 = int_to_ptr.vmem [resolvable:$true] %s212_s7 }
  0x3b   :  { %s332_s8 = scalar_lea.vmem %s213_s7, 64  ;;  %p337_p11 = scmp.lt.s32.totalorder %s213_s7, %s213_s7 }
  0x3c   :  { %p333_p10 = scmp.ne.s32.totalorder %s213_s7, %s332_s8  ;;  %p338_p12 = scmp.lt.s32.totalorder %s332_s8, %s332_s8 }
  0x3d   :  { %239 = vmatpush3.bf16.msra.mxu0 %v261_v2  ;;  %247 = vmatpush3.bf16.msra.mxu1 %v263_v6 }
  0x3e   :  { %p339_p13 = por %p338_p12, %p337_p11 }
  0x40   :  { %241 = vmatmul.mubr.msk.bf16.vlgmr.msra.gmra.mrb[0].mxu0 %vm86_vm1, %v62_v4  ;;  %p340_p0 = pnand %p339_p13, %p333_p10 }
 0x113   :  { %v124_v8 = vpop.f32.mrb[0].mxu0 }
 0x114   :  { %v125_v9 = vadd.f32 %v222_v7, %v124_v8  ;;  %v242_v10 = vpop.f32.mrb[1].mxu0 }
 0x115   :  { %v127_v11 = vpop.f32.mrb[2].mxu0 }
 0x116   :  { %v130_v12 = vmax.f32 %v125_v9, 0.0  ;;  %v243_v13 = vpop.f32.mrb[3].mxu0 }
 0x118   :  { %v131_v14 = vpack.c.bf16 %v130_v12, %v130_v12 }
 0x11a   :  { %249 = vmatmul.mubr.msk.bf16.vlgmr.msra.gmra.mrb[0].mxu1 %vm86_vm1, %v131_v14 }
 0x1ed   :  { %v192_v16 = vpop.f32.mrb[0].mxu1 }
 0x1ee   :  { %v193_v17 = vadd.f32 %v226_v15, %v192_v16  ;;  %v250_v18 = vpop.f32.mrb[1].mxu1 }
 0x1ef   :  { %v195_v19 = vpop.f32.mrb[2].mxu1 }
 0x1f0   :  { %v251_v20 = vpop.f32.mrb[3].mxu1  ;;  %v198_v21 = vmul.f32 %v193_v17, %v193_v17 }
 0x1f2   :  { %199 = vadd.xlane.f32.xlu0 %v198_v21 }
 0x27f   :  { %v200_v22 = vpop.xlane.xlu0 %199 }
 0x280   :  { %v201_v23 = vmax.f32 %v200_v22, 1e-24 }
 0x282   :  { %264 = vrsqrt.f32 %v201_v23 }
 0x28c   :  { %v265_v24 = vpop.eup %264 }
 0x28d   :  { %v203_v25 = vmul.f32 %v265_v24, %v193_v17 }
 0x28f   :  { %v204_v26 = vpack.c.bf16 %v203_v25, %v203_v25 }
 0x291   :  { %205 = vst [vmem:[#allocation8] sm:$0xf] %v204_v26 }
 0x292   :  { %343 = shalt.err (!%p340_p0)
}
 0x293   :  { %s344_s10 = scalar_lea.hbm %s463_s5, 64 }
 0x294   :  { %p345_p1 = scmp.ne.s32.totalorder %s463_s5, %s344_s10  ;;  %p348_p2 = scmp.lt.u32.totalorder %s344_s10, %s463_s5 }
 0x296   :  { %p350_p3 = pnand %p348_p2, %p345_p1 }
 0x298   :  { %353 = shalt.err (!%p350_p3)
}
 0x299   :  { %215 = dma.vmem_to_hbm [thread:$0]  %s213_s7, 64, %s463_s5, [#allocation4]  }
 0x29a   :  { %358 = dma.done.wait [#allocation4], 64  }
 0x29b   :  { %359 = vsyncadd [#allocation4], 4294967232 }
 0x29c   :  { %219 = vsyncpa [#allocation3], 1 }
 0x29d   :  { %220 = vsyncpa [#allocation6], 1 }
 0x29e   :  { %221 = vsyncpa [#allocation4], 1 }

</bundles_post_ra>
